<compile_context>
chip_gen: v7x
topology: tpu7x:2x2x1
jax: 0.10.0
libtpu: 0.0.40
codegen_flags: <defaults>
</compile_context>

<pallas_src>
import numpy as np

import jax
import jax.numpy as jnp
from jax.experimental import pallas as pl
from jax.experimental.pallas import tpu as pltpu


def _round_up(x, m):
    return ((x + m - 1) // m) * m


def _vmem_capacity_bytes():
    """Physical VMEM per core; conservative (v7x-sized) fallback."""
    try:
        info = pltpu.get_tpu_info()
        cap = getattr(info, "vmem_capacity_bytes", None)
        if cap:
            return int(cap)
    except Exception:
        pass
    return 64 << 20


# --------------------------------------------------------------------------
# Kernels
# --------------------------------------------------------------------------

def _sae_resident_kernel(x_ref, we_ref, be_ref, wd_ref, bd_ref,
                         recon_ref, sparse_ref):
    """Weights fully VMEM-resident (constant block index); 1-D grid over batch."""
    h = jnp.dot(x_ref[...], we_ref[...], preferred_element_type=jnp.float32)
    h = jnp.maximum(h + be_ref[...], 0.0)                    # f32 [tB, Hp]
    h_lo = h.astype(wd_ref.dtype)
    sparse_ref[...] = (h_lo if sparse_ref.dtype == h_lo.dtype
                       else h.astype(sparse_ref.dtype))
    recon = jnp.dot(h_lo, wd_ref[...], preferred_element_type=jnp.float32)
    recon_ref[...] = (recon + bd_ref[...]).astype(recon_ref.dtype)


def _sae_stream_kernel(x_ref, we_ref, be_ref, wd_ref, bd_ref,
                       recon_ref, sparse_ref, *scratch):
    """Weights streamed in hidden-dim slabs; grid = (batch tiles, hidden tiles)."""
    j = pl.program_id(1)
    nj = pl.num_programs(1)
    # f32 outputs accumulate directly into the resident recon tile; otherwise
    # use the f32 scratch accumulator.
    acc_ref = scratch[0] if scratch else recon_ref

    h = jnp.dot(x_ref[...], we_ref[...], preferred_element_type=jnp.float32)
    h = jnp.maximum(h + be_ref[...], 0.0)                    # f32 [tB, tH]
    h_lo = h.astype(wd_ref.dtype)
    sparse_ref[...] = (h_lo if sparse_ref.dtype == h_lo.dtype
                       else h.astype(sparse_ref.dtype))

    contrib = jnp.dot(h_lo, wd_ref[...], preferred_element_type=jnp.float32)

    @pl.when(j == 0)
    def _():
        acc_ref[...] = contrib                               # no zero-init pass

    @pl.when(j != 0)
    def _():
        acc_ref[...] = acc_ref[...] + contrib

    @pl.when(j == nj - 1)
    def _():
        recon_ref[...] = (acc_ref[...] + bd_ref[...]).astype(recon_ref.dtype)


# --------------------------------------------------------------------------
# VMEM planning
# --------------------------------------------------------------------------

def _estimate_resident_vmem(tB, Dp, Hp, x_by, w_by, o_by):
    b = 2 * (Dp * Hp + Hp * Dp) * w_by          # both weights (double-buffer budget)
    b += 2 * tB * Dp * x_by                     # x tile
    b += 2 * tB * Dp * o_by + 2 * tB * Hp * o_by  # recon / sparse tiles
    b += 2 * (Hp + Dp) * 4                      # biases
    return b


def _estimate_stream_vmem(tB, tH, Dp, x_by, w_by, o_by, need_acc):
    b = 2 * tB * Dp * x_by                      # x tile (resident over j)
    b += 2 * Dp * tH * w_by + 2 * tH * Dp * w_by  # W_enc / W_dec slabs
    b += 2 * tB * Dp * o_by + 2 * tB * tH * o_by  # recon / sparse tiles
    b += 2 * (tH + Dp) * 4                      # biases
    if need_acc:
        b += tB * Dp * 4                        # f32 accumulator scratch
    return b


# --------------------------------------------------------------------------
# Wrappers
# --------------------------------------------------------------------------

def prepare_sae_weights(w_enc, b_enc, w_dec, b_dec, *, compute_dtype=None):
    """Transpose + pad weights once (hoisted out of the per-call hot path)."""
    H, D = w_enc.shape
    if compute_dtype is None:
        compute_dtype = jnp.promote_types(w_enc.dtype, w_dec.dtype)
    compute_dtype = np.dtype(compute_dtype)
    Dp = _round_up(D, 128)
    Hp = _round_up(H, 128)
    we_t = w_enc.T.astype(compute_dtype)
    wd_t = w_dec.T.astype(compute_dtype)
    if (Dp, Hp) != (D, H):
        we_t = jnp.zeros((Dp, Hp), compute_dtype).at[:D, :H].set(we_t)
        wd_t = jnp.zeros((Hp, Dp), compute_dtype).at[:H, :D].set(wd_t)
    be = jnp.zeros((1, Hp), jnp.float32).at[0, :H].set(b_enc.astype(jnp.float32))
    bd = jnp.zeros((1, Dp), jnp.float32).at[0, :D].set(b_dec.astype(jnp.float32))
    return dict(we_t=we_t, be=be, wd_t=wd_t, bd=bd, D=D, H=H)


def _call_resident(xp_src, we_t, be, wd_t, bd, B, D, H, Dp, Hp, tB,
                   cdt, odt, vmem_limit):
    Bp = _round_up(B, tB)
    xp = xp_src.astype(cdt)
    if (Bp, Dp) != (B, D):
        xp = jnp.zeros((Bp, Dp), cdt).at[:B, :D].set(xp)
    grid = (Bp // tB,)
    recon, sparse = pl.pallas_call(
        _sae_resident_kernel,
        out_shape=(jax.ShapeDtypeStruct((Bp, Dp), odt),
                   jax.ShapeDtypeStruct((Bp, Hp), odt)),
        grid_spec=pltpu.PrefetchScalarGridSpec(
            num_scalar_prefetch=0,
            grid=grid,
            in_specs=[
                pl.BlockSpec((tB, Dp), lambda i: (i, 0)),   # x tile
                pl.BlockSpec((Dp, Hp), lambda i: (0, 0)),   # W_enc.T (resident)
                pl.BlockSpec((1, Hp), lambda i: (0, 0)),    # b_enc
                pl.BlockSpec((Hp, Dp), lambda i: (0, 0)),   # W_dec.T (resident)
                pl.BlockSpec((1, Dp), lambda i: (0, 0)),    # b_dec
            ],
            out_specs=[
                pl.BlockSpec((tB, Dp), lambda i: (i, 0)),   # recon
                pl.BlockSpec((tB, Hp), lambda i: (i, 0)),   # sparse
            ],
        ),
        compiler_params=pltpu.CompilerParams(
            dimension_semantics=("parallel",),
            vmem_limit_bytes=vmem_limit,
        ),
    )(xp, we_t, be, wd_t, bd)
    if (Bp, Dp, Hp) != (B, D, H):
        recon = recon[:B, :D]
        sparse = sparse[:B, :H]
    return recon, sparse


def _call_stream(xp_src, we_t, be, wd_t, bd, B, D, H, Dp, Hp, tB, tH,
                 cdt, odt, vmem_limit):
    Bp = _round_up(B, tB)
    xp = xp_src.astype(cdt)
    if (Bp, Dp) != (B, D):
        xp = jnp.zeros((Bp, Dp), cdt).at[:B, :D].set(xp)
    need_acc = np.dtype(odt) != np.dtype(jnp.float32)
    scratch = [pltpu.VMEM((tB, Dp), jnp.float32)] if need_acc else []
    grid = (Bp // tB, Hp // tH)
    recon, sparse = pl.pallas_call(
        _sae_stream_kernel,
        out_shape=(jax.ShapeDtypeStruct((Bp, Dp), odt),
                   jax.ShapeDtypeStruct((Bp, Hp), odt)),
        grid_spec=pltpu.PrefetchScalarGridSpec(
            num_scalar_prefetch=0,
            grid=grid,
            in_specs=[
                pl.BlockSpec((tB, Dp), lambda i, j: (i, 0)),   # x tile (resident over j)
                pl.BlockSpec((Dp, tH), lambda i, j: (0, j)),   # W_enc.T slab
                pl.BlockSpec((1, tH), lambda i, j: (0, j)),    # b_enc slab
                pl.BlockSpec((tH, Dp), lambda i, j: (j, 0)),   # W_dec.T slab
                pl.BlockSpec((1, Dp), lambda i, j: (0, 0)),    # b_dec
            ],
            out_specs=[
                pl.BlockSpec((tB, Dp), lambda i, j: (i, 0)),   # recon (acc over j)
                pl.BlockSpec((tB, tH), lambda i, j: (i, j)),   # sparse
            ],
            scratch_shapes=scratch,
        ),
        compiler_params=pltpu.CompilerParams(
            dimension_semantics=("parallel", "arbitrary"),
            vmem_limit_bytes=vmem_limit,
        ),
    )(xp, we_t, be, wd_t, bd)
    if (Bp, Dp, Hp) != (B, D, H):
        recon = recon[:B, :D]
        sparse = sparse[:B, :H]
    return recon, sparse


def sae_apply(x, params, *, compute_dtype=None, out_dtype=None,
              block_b=None, block_h=None, allow_resident=True):
    """Apply an SAE (prepared with prepare_sae_weights) to x: [B, D]."""
    we_t, be, wd_t, bd = params["we_t"], params["be"], params["wd_t"], params["bd"]
    D, H = params["D"], params["H"]
    Dp, Hp = we_t.shape
    B = x.shape[0]

    # Compute dtype: promote (matches the reference for mixed dtypes); users can
    # opt into lower precision explicitly via compute_dtype=.
    cdt = (np.dtype(compute_dtype) if compute_dtype is not None
           else np.dtype(jnp.promote_types(x.dtype, we_t.dtype)))
    if we_t.dtype != cdt:
        we_t = we_t.astype(cdt)
        wd_t = wd_t.astype(cdt)
    odt = np.dtype(out_dtype) if out_dtype is not None else cdt

    x_by = cdt.itemsize
    w_by = cdt.itemsize
    o_by = odt.itemsize

    cap = _vmem_capacity_bytes()
    vmem_limit = int(0.85 * cap)            # never the full physical VMEM (v7x!)
    plan_budget = int(0.9 * vmem_limit)

    # Generation-aware default tiles: bigger batch tiles -> more weight reuse.
    big_vmem = cap >= (100 << 20)           # 128 MiB parts (v5e/v6e) vs 64 MiB (v7x)
    tB0 = block_b if block_b is not None else (1024 if big_vmem else 512)
    tH0 = block_h if block_h is not None else 256
    tB0 = max(8, _round_up(tB0, 8))
    tH0 = max(128, _round_up(tH0, 128))

    Bp8 = _round_up(B, 8)

    # ---- Fast path: weights fully VMEM-resident (DMA'd once per call). ----
    if allow_resident and block_h is None:
        tB = min(tB0, Bp8)
        while tB > 256 and _estimate_resident_vmem(tB, Dp, Hp, x_by, w_by, o_by) > plan_budget:
            tB = _round_up(max(tB // 2, 256), 8)
        if _estimate_resident_vmem(tB, Dp, Hp, x_by, w_by, o_by) <= plan_budget:
            return _call_resident(x, we_t, be, wd_t, bd, B, D, H, Dp, Hp, tB,
                                  cdt, odt, vmem_limit)

    # ---- Streamed path: weights in (D, tH)/(tH, D) slabs over a hidden axis. ----
    need_acc = odt != np.dtype(jnp.float32)
    tB = min(tB0, Bp8)
    tH = min(tH0, Hp)
    while Hp % tH:
        tH -= 128
    while (_estimate_stream_vmem(tB, tH, Dp, x_by, w_by, o_by, need_acc) > plan_budget
           and (tB > 256 or tH > 128)):
        if tB > 256:
            tB = _round_up(max(tB // 2, 256), 8)
        else:
            tH = max(128, tH - 128)
            while Hp % tH:
                tH -= 128
    return _call_stream(x, we_t, be, wd_t, bd, B, D, H, Dp, Hp, tB, tH,
                        cdt, odt, vmem_limit)


def sae_forward(x, w_enc, b_enc, w_dec, b_dec, *, compute_dtype=None, **kwargs):
    """Convenience wrapper: prepare weights and apply in one call."""
    params = prepare_sae_weights(w_enc, b_enc, w_dec, b_dec,
                                 compute_dtype=compute_dtype)
    return sae_apply(x, params, compute_dtype=compute_dtype, **kwargs)


# --------------------------------------------------------------------------
# Reference + tests
# --------------------------------------------------------------------------

def sae_reference(x, w_enc, b_enc, w_dec, b_dec):
    xf = x.astype(jnp.float32)
    h = jnp.maximum(xf @ w_enc.T.astype(jnp.float32) + b_enc.astype(jnp.float32), 0.0)
    recon = h @ w_dec.T.astype(jnp.float32) + b_dec.astype(jnp.float32)
    return recon, h


def _make_params(key, B, D, H, dtype=jnp.float32):
    kx, k1, k2, k3, k4 = jax.random.split(key, 5)
    x = jax.random.normal(kx, (B, D), dtype=dtype)
    bound_e = 1.0 / (D ** 0.5)
    bound_d = 1.0 / (H ** 0.5)
    w_enc = jax.random.uniform(k1, (H, D), dtype, -bound_e, bound_e)
    b_enc = jax.random.uniform(k2, (H,), dtype, -bound_e, bound_e)
    w_dec = jax.random.uniform(k3, (D, H), dtype, -bound_d, bound_d)
    b_dec = jax.random.uniform(k4, (D,), dtype, -bound_d, bound_d)
    return x, w_enc, b_enc, w_dec, b_dec


if __name__ == "__main__":
    key = jax.random.PRNGKey(0)
    k_a, k_b, k_c = jax.random.split(key, 3)

    # Test 1: small aligned shapes (batch=8, input_dim=32, hidden_dim=64)
    # -> weights-resident fast path.
    x, w_enc, b_enc, w_dec, b_dec = _make_params(k_a, 8, 32, 64)
    recon, sparse = jax.block_until_ready(
        sae_forward(x, w_enc, b_enc, w_dec, b_dec))
    recon_ref, sparse_ref = sae_reference(x, w_enc, b_enc, w_dec, b_dec)
    assert recon.shape == (8, 32) and sparse.shape == (8, 64)
    assert jnp.allclose(recon, recon_ref, atol=1e-5, rtol=1e-5)
    assert jnp.allclose(sparse, sparse_ref, atol=1e-5, rtol=1e-5)

    # Test 2: ragged shapes exercising the padding path (B=10, D=48, H=100).
    x, w_enc, b_enc, w_dec, b_dec = _make_params(k_b, 10, 48, 100)
    recon, sparse = jax.block_until_ready(
        sae_forward(x, w_enc, b_enc, w_dec, b_dec))
    recon_ref, sparse_ref = sae_reference(x, w_enc, b_enc, w_dec, b_dec)
    assert recon.shape == (10, 48) and sparse.shape == (10, 100)
    assert jnp.allclose(recon, recon_ref, atol=1e-5, rtol=1e-5)
    assert jnp.allclose(sparse, sparse_ref, atol=1e-5, rtol=1e-5)

    # Test 3: force the streamed (hidden-tiled) path, f32 output ->
    # decoder accumulates directly into the resident recon tile (no scratch).
    x, w_enc, b_enc, w_dec, b_dec = _make_params(k_c, 16, 128, 512)
    recon, sparse = jax.block_until_ready(
        sae_forward(x, w_enc, b_enc, w_dec, b_dec,
                    allow_resident=False, block_b=8, block_h=128))
    recon_ref, sparse_ref = sae_reference(x, w_enc, b_enc, w_dec, b_dec)
    assert recon.shape == (16, 128) and sparse.shape == (16, 512)
    assert jnp.allclose(recon, recon_ref, atol=1e-4, rtol=1e-4)
    assert jnp.allclose(sparse, sparse_ref, atol=1e-4, rtol=1e-4)

    # Test 4: streamed path with bf16 outputs (exercises the f32 scratch
    # accumulator branch); compute stays f32, only the final cast differs.
    recon, sparse = jax.block_until_ready(
        sae_forward(x, w_enc, b_enc, w_dec, b_dec,
                    out_dtype=jnp.bfloat16,
                    allow_resident=False, block_b=8, block_h=128))
    assert recon.dtype == jnp.bfloat16 and sparse.dtype == jnp.bfloat16
    assert jnp.allclose(recon.astype(jnp.float32),
                        recon_ref.astype(jnp.bfloat16).astype(jnp.float32),
                        atol=2e-2, rtol=2e-2)
    assert jnp.allclose(sparse.astype(jnp.float32),
                        sparse_ref.astype(jnp.bfloat16).astype(jnp.float32),
                        atol=2e-2, rtol=2e-2)

    print("KERNEL_OK")
</pallas_src>

<mosaic_0001>
module attributes {stable_mosaic.version = 11 : i64} {
  func.func @_sae_resident_kernel(%arg0: i32, %arg1: memref<8x128xf32, #tpu.memory_space<vmem>>, %arg2: memref<128x128xf32, #tpu.memory_space<vmem>>, %arg3: memref<1x128xf32, #tpu.memory_space<vmem>>, %arg4: memref<128x128xf32, #tpu.memory_space<vmem>>, %arg5: memref<1x128xf32, #tpu.memory_space<vmem>>, %arg6: memref<8x128xf32, #tpu.memory_space<vmem>>, %arg7: memref<8x128xf32, #tpu.memory_space<vmem>>) attributes {dimension_semantics = [#tpu.dimension_semantics<parallel>], iteration_bounds = array<i64: 1>, scalar_prefetch = 0 : i64, scratch_operands = 0 : i64, tpu.core_type = #tpu.core_type<tc>, window_params = [{transform_indices = @transform_0, window_bounds = array<i64: 8, 128>}, {pipeline_mode = #tpu.pipeline_mode<synchronous>, transform_indices = @transform_1, window_bounds = array<i64: 128, 128>}, {pipeline_mode = #tpu.pipeline_mode<synchronous>, transform_indices = @transform_2, window_bounds = array<i64: 1, 128>}, {pipeline_mode = #tpu.pipeline_mode<synchronous>, transform_indices = @transform_3, window_bounds = array<i64: 128, 128>}, {pipeline_mode = #tpu.pipeline_mode<synchronous>, transform_indices = @transform_4, window_bounds = array<i64: 1, 128>}, {transform_indices = @transform_5, window_bounds = array<i64: 8, 128>}, {transform_indices = @transform_6, window_bounds = array<i64: 8, 128>}]} {
    %c0 = arith.constant 0 : index
    %c0_0 = arith.constant 0 : index
    %0 = vector.load %arg1[%c0, %c0_0] : memref<8x128xf32, #tpu.memory_space<vmem>>, vector<8x128xf32>
    %c0_1 = arith.constant 0 : index
    %c0_2 = arith.constant 0 : index
    %1 = vector.load %arg2[%c0_1, %c0_2] : memref<128x128xf32, #tpu.memory_space<vmem>>, vector<128x128xf32>
    %cst = arith.constant dense<0.000000e+00> : vector<8x128xf32>
    %2 = tpu.matmul %0, %1, %cst {dimension_numbers = #tpu.dot_dimension_numbers<[1], [0], [0], [1], [0, 0, 1, 1], [], []>} : vector<8x128xf32>, vector<128x128xf32>, vector<8x128xf32> -> vector<8x128xf32>
    %c0_3 = arith.constant 0 : index
    %c0_4 = arith.constant 0 : index
    %3 = vector.load %arg3[%c0_3, %c0_4] : memref<1x128xf32, #tpu.memory_space<vmem>>, vector<1x128xf32>
    %4 = vector.broadcast %3 : vector<1x128xf32> to vector<8x128xf32>
    %5 = arith.addf %2, %4 : vector<8x128xf32>
    %cst_5 = arith.constant 0.000000e+00 : f32
    %6 = vector.broadcast %cst_5 : f32 to vector<8x128xf32>
    %7 = arith.maximumf %5, %6 : vector<8x128xf32>
    %c0_6 = arith.constant 0 : index
    %c0_7 = arith.constant 0 : index
    %8 = vector.load %arg7[%c0_6, %c0_7] : memref<8x128xf32, #tpu.memory_space<vmem>>, vector<8x128xf32>
    tpu.vector_store %arg7[%c0_6, %c0_7], %7 {strides = array<i32>} : memref<8x128xf32, #tpu.memory_space<vmem>>, vector<8x128xf32>,
    %c0_8 = arith.constant 0 : index
    %c0_9 = arith.constant 0 : index
    %9 = vector.load %arg4[%c0_8, %c0_9] : memref<128x128xf32, #tpu.memory_space<vmem>>, vector<128x128xf32>
    %cst_10 = arith.constant dense<0.000000e+00> : vector<8x128xf32>
    %10 = tpu.matmul %7, %9, %cst_10 {dimension_numbers = #tpu.dot_dimension_numbers<[1], [0], [0], [1], [0, 0, 1, 1], [], []>} : vector<8x128xf32>, vector<128x128xf32>, vector<8x128xf32> -> vector<8x128xf32>
    %c0_11 = arith.constant 0 : index
    %c0_12 = arith.constant 0 : index
    %11 = vector.load %arg5[%c0_11, %c0_12] : memref<1x128xf32, #tpu.memory_space<vmem>>, vector<1x128xf32>
    %12 = vector.broadcast %11 : vector<1x128xf32> to vector<8x128xf32>
    %13 = arith.addf %10, %12 : vector<8x128xf32>
    %c0_13 = arith.constant 0 : index
    %c0_14 = arith.constant 0 : index
    %14 = vector.load %arg6[%c0_13, %c0_14] : memref<8x128xf32, #tpu.memory_space<vmem>>, vector<8x128xf32>
    tpu.vector_store %arg6[%c0_13, %c0_14], %13 {strides = array<i32>} : memref<8x128xf32, #tpu.memory_space<vmem>>, vector<8x128xf32>,
    return
  }
  func.func @transform_0(%arg0: i32) -> (i32, i32) {
    %c0_i32 = arith.constant 0 : i32
    %c0_i32_0 = arith.constant 0 : i32
    return %arg0, %c0_i32 : i32, i32
  }
  func.func @transform_1(%arg0: i32) -> (i32, i32) {
    %c0_i32 = arith.constant 0 : i32
    %c0_i32_0 = arith.constant 0 : i32
    %c0_i32_1 = arith.constant 0 : i32
    return %c0_i32, %c0_i32_0 : i32, i32
  }
  func.func @transform_2(%arg0: i32) -> (i32, i32) {
    %c0_i32 = arith.constant 0 : i32
    %c0_i32_0 = arith.constant 0 : i32
    %c0_i32_1 = arith.constant 0 : i32
    return %c0_i32, %c0_i32_0 : i32, i32
  }
  func.func @transform_3(%arg0: i32) -> (i32, i32) {
    %c0_i32 = arith.constant 0 : i32
    %c0_i32_0 = arith.constant 0 : i32
    %c0_i32_1 = arith.constant 0 : i32
    return %c0_i32, %c0_i32_0 : i32, i32
  }
  func.func @transform_4(%arg0: i32) -> (i32, i32) {
    %c0_i32 = arith.constant 0 : i32
    %c0_i32_0 = arith.constant 0 : i32
    %c0_i32_1 = arith.constant 0 : i32
    return %c0_i32, %c0_i32_0 : i32, i32
  }
  func.func @transform_5(%arg0: i32) -> (i32, i32) {
    %c0_i32 = arith.constant 0 : i32
    %c0_i32_0 = arith.constant 0 : i32
    return %arg0, %c0_i32 : i32, i32
  }
  func.func @transform_6(%arg0: i32) -> (i32, i32) {
    %c0_i32 = arith.constant 0 : i32
    %c0_i32_0 = arith.constant 0 : i32
    return %arg0, %c0_i32 : i32, i32
  }
}

</mosaic_0001>

<bundles_post_ra>
// kernel: tpu_custom_call.1
= control target key start
LH: loop header
LB: loop body
LE: loop exit
PB: predicated region body
PF: predicated region fallthrough
CT: control target
= control target key end

     0   :  { %12 = vsyncpa [#allocation3], 0  ;;  %s698_s0 = inlined_call_operand.hbm [shape: f32[8,128], index: 0, kind: input, shape index: {}]   ;;  %s699_s1 = inlined_call_operand.hbm [shape: f32[128,128], index: 1, kind: input, shape index: {}]   ;;  %s700_s2 = inlined_call_operand.vmem [shape: f32[1,128], index: 2, kind: input, shape index: {}]   ;;  %s701_s3 = inlined_call_operand.hbm [shape: f32[128,128], index: 3, kind: input, shape index: {}]   ;;  %s702_s4 = inlined_call_operand.vmem [shape: f32[1,128], index: 4, kind: input, shape index: {}]   ;;  %s703_s5 = inlined_call_operand.hbm [shape: f32[8,128], index: 5, kind: output, shape index: {0}]   ;;  %s704_s6 = inlined_call_operand.hbm [shape: f32[8,128], index: 6, kind: output, shape index: {1}]  }
   0x1   :  { %13 = vsyncpa [#allocation6], 0 }
   0x2   :  { %14 = vsyncpa [#allocation4], 0 }
   0x3   :  { %15 = vsyncpa [#allocation10], 0  ;;  %s565_s21 = smov [#allocation5]   ;;  %s447_s25 = scalar_lea.hbm %s699_s1, 2048 }
   0x4   :  { %s31_s22 = sshll.u32 %s565_s21, 4  ;;  %p448_p0 = scmp.ne.s32.totalorder %s699_s1, %s447_s25  ;;  %s32_s22 = int_to_ptr.vmem [resolvable:$true] %s31_s22 }
   0x5   :  { %p451_p1 = scmp.lt.u32.totalorder %s447_s25, %s699_s1 }
   0x7   :  { %p453_p2 = pnand %p451_p1, %p448_p0 }
   0x9   :  { %456 = shalt.err (!%p453_p2)
}
   0xa   :  { %s457_s30 = scalar_lea.vmem %s32_s22, 2048  ;;  %p462_p4 = scmp.lt.s32.totalorder %s32_s22, %s32_s22 }
   0xb   :  { %p458_p3 = scmp.ne.s32.totalorder %s32_s22, %s457_s30  ;;  %p463_p5 = scmp.lt.s32.totalorder %s457_s30, %s457_s30 }
   0xd   :  { %p464_p6 = por %p463_p5, %p462_p4 }
   0xf   :  { %p465_p7 = pnand %p464_p6, %p458_p3 }
  0x11   :  { %468 = shalt.err (!%p465_p7)
}
  0x12   :  { %s566_s7 = smov 128   ;;  %s567_s8 = smov 8  }
  0x13   :  { %37 = dma.hbm_to_vmem [thread:$0]  %s699_s1, 2048, %s32_s22, [#allocation6], %s566_s7, %s566_s7, %s567_s8  }
  0x14   :  { %s568_s11 = smov [#allocation2]   ;;  %s569_s13 = smov [#allocation7]  }
  0x15   :  { %s22_s12 = sshll.u32 %s568_s11, 4  ;;  %s45_s14 = sshll.u32 %s569_s13, 4  ;;  %s23_s12 = int_to_ptr.vmem [resolvable:$true] %s22_s12  ;;  %s46_s14 = int_to_ptr.vmem [resolvable:$true] %s45_s14 }
  0x16   :  { %s469_s17 = scalar_lea.hbm %s698_s0, 128 }
  0x17   :  { %p470_p8 = scmp.ne.s32.totalorder %s698_s0, %s469_s17  ;;  %p473_p9 = scmp.lt.u32.totalorder %s469_s17, %s698_s0 }
  0x19   :  { %p475_p10 = pnand %p473_p9, %p470_p8 }
  0x1b   :  { %478 = shalt.err (!%p475_p10)
}
  0x1c   :  { %s479_s1 = scalar_lea.vmem %s23_s12, 128  ;;  %p484_p12 = scmp.lt.s32.totalorder %s23_s12, %s23_s12 }
  0x1d   :  { %p480_p11 = scmp.ne.s32.totalorder %s23_s12, %s479_s1  ;;  %p485_p13 = scmp.lt.s32.totalorder %s479_s1, %s479_s1 }
  0x1f   :  { %p486_p0 = por %p485_p13, %p484_p12 }
  0x21   :  { %p487_p1 = pnand %p486_p0, %p480_p11 }
  0x23   :  { %490 = shalt.err (!%p487_p1)
}
  0x24   :  { %25 = dma.hbm_to_vmem [thread:$0]  %s698_s0, 128, %s23_s12, [#allocation3]  }
  0x25   :  { %s491_s26 = scalar_lea.hbm %s701_s3, 2048 }
  0x26   :  { %p492_p2 = scmp.ne.s32.totalorder %s701_s3, %s491_s26  ;;  %p495_p3 = scmp.lt.u32.totalorder %s491_s26, %s701_s3 }
  0x28   :  { %p497_p4 = pnand %p495_p3, %p492_p2 }
  0x2a   :  { %500 = shalt.err (!%p497_p4)
}
  0x2b   :  { %s501_s9 = scalar_lea.vmem %s46_s14, 2048  ;;  %p506_p6 = scmp.lt.s32.totalorder %s46_s14, %s46_s14 }
  0x2c   :  { %p502_p5 = scmp.ne.s32.totalorder %s46_s14, %s501_s9  ;;  %p507_p7 = scmp.lt.s32.totalorder %s501_s9, %s501_s9 }
  0x2e   :  { %p508_p8 = por %p507_p7, %p506_p6 }
  0x30   :  { %p509_p9 = pnand %p508_p8, %p502_p5 }
  0x32   :  { %512 = shalt.err (!%p509_p9)
}
  0x33   :  { %51 = dma.hbm_to_vmem [thread:$0]  %s701_s3, 2048, %s46_s14, [#allocation6], %s566_s7, %s566_s7, %s567_s8  }
  0x34   :  { %557 = dma.done.wait [#allocation3], 128  }
  0x35   :  { %558 = vsyncadd [#allocation3], 4294967168 }
  0x36   :  { %559 = dma.done.wait [#allocation6], 4096  }
  0x37   :  { %560 = vsyncadd [#allocation6], 4294963200  ;;  %v570_v0 = vmov 0.0|0.0   ;;  %vm571_vm0 = vmmov 0   ;;  %v572_v1 = vmov 0.0   ;;  %v64_v2 = vld [vmem:[#allocation5] sm:$0xff] }
  0x38   :  { %389 = vmatprep.subr.bf16.mxu0 %v570_v0  ;;  %351 = vmatprep.mubr.msk.f32.mxu0 %vm571_vm0, %v572_v1  ;;  %v65_v3 = vld [vmem:[#allocation5 + $0x8] sm:$0xff]  ;;  %v66_v4 = vld [vmem:[#allocation5 + $0x10] sm:$0xff]  ;;  %v67_v6 = vld [vmem:[#allocation5 + $0x18] sm:$0xff]  ;;  %s573_s8 = smov [#allocation9]  }
  0x39   :  { %413 = vmatprep.subr.bf16.mxu1 %v570_v0  ;;  %386 = vmatprep.mubr.msk.f32.mxu1 %vm571_vm0, %v572_v1  ;;  %v390_v5 = vpack.c.bf16 %v65_v3, %v64_v2  ;;  %v393_v7 = vpack.c.bf16 %v67_v6, %v66_v4  ;;  %v68_v8 = vld [vmem:[#allocation5 + $0x20] sm:$0xff]  ;;  %v69_v9 = vld [vmem:[#allocation5 + $0x28] sm:$0xff]  ;;  %v161_v12 = vld [vmem:[#allocation7 + $0x10] sm:$0xff]  ;;  %s269_s11 = sshll.u32 %s573_s8, 4  ;;  %s270_s11 = int_to_ptr.vmem [resolvable:$true] %s269_s11 }
  0x3a   :  { %v159_v10 = vld [vmem:[#allocation7] sm:$0xff]  ;;  %v160_v11 = vld [vmem:[#allocation7 + $0x8] sm:$0xff]  ;;  %v162_v13 = vld [vmem:[#allocation7 + $0x18] sm:$0xff]  ;;  %v396_v14 = vpack.c.bf16 %v69_v9, %v68_v8  ;;  %s513_s12 = scalar_lea.vmem %s270_s11, 128  ;;  %p518_p11 = scmp.lt.s32.totalorder %s270_s11, %s270_s11 }
  0x3b   :  { %391 = vmatpush3.bf16.msra.mxu0 %v390_v5  ;;  %v414_v15 = vpack.c.bf16 %v160_v11, %v159_v10  ;;  %v70_v16 = vld [vmem:[#allocation5 + $0x30] sm:$0xff]  ;;  %v71_v17 = vld [vmem:[#allocation5 + $0x38] sm:$0xff]  ;;  %v417_v18 = vpack.c.bf16 %v162_v13, %v161_v12  ;;  %v163_v19 = vld [vmem:[#allocation7 + $0x20] sm:$0xff]  ;;  %p514_p10 = scmp.ne.s32.totalorder %s270_s11, %s513_s12  ;;  %p519_p12 = scmp.lt.s32.totalorder %s513_s12, %s513_s12 }
  0x3c   :  { %392 = vmatprep.subr.bf16.mxu0 %v570_v0  ;;  %v164_v20 = vld [vmem:[#allocation7 + $0x28] sm:$0xff]  ;;  %v399_v21 = vpack.c.bf16 %v71_v17, %v70_v16  ;;  %v72_v22 = vld [vmem:[#allocation5 + $0x40] sm:$0xff]  ;;  %v165_v25 = vld [vmem:[#allocation7 + $0x30] sm:$0xff] }
  0x3d   :  { %415 = vmatpush3.bf16.msra.mxu1 %v414_v15  ;;  %v73_v23 = vld [vmem:[#allocation5 + $0x48] sm:$0xff]  ;;  %v420_v24 = vpack.c.bf16 %v164_v20, %v163_v19  ;;  %v166_v26 = vld [vmem:[#allocation7 + $0x38] sm:$0xff]  ;;  %v74_v28 = vld [vmem:[#allocation5 + $0x50] sm:$0xff]  ;;  %p520_p13 = por %p519_p12, %p518_p11 }
  0x3e   :  { %416 = vmatprep.subr.bf16.mxu1 %v570_v0  ;;  %v402_v27 = vpack.c.bf16 %v73_v23, %v72_v22  ;;  %v75_v29 = vld [vmem:[#allocation5 + $0x58] sm:$0xff]  ;;  %v423_v30 = vpack.c.bf16 %v166_v26, %v165_v25  ;;  %v167_v31 = vld [vmem:[#allocation7 + $0x40] sm:$0xff]  ;;  %v168_v32 = vld [vmem:[#allocation7 + $0x48] sm:$0xff] }
  0x3f   :  { %394 = vmatpush3.bf16.msra.mxu0 %v393_v7  ;;  %v405_v33 = vpack.c.bf16 %v75_v29, %v74_v28  ;;  %v76_v34 = vld [vmem:[#allocation5 + $0x60] sm:$0xff]  ;;  %v77_v35 = vld [vmem:[#allocation5 + $0x68] sm:$0xff]  ;;  %v426_v36 = vpack.c.bf16 %v168_v32, %v167_v31  ;;  %v169_v37 = vld [vmem:[#allocation7 + $0x50] sm:$0xff]  ;;  %p521_p0 = pnand %p520_p13, %p514_p10 }
  0x40   :  { %395 = vmatprep.subr.bf16.mxu0 %v570_v0  ;;  %v170_v38 = vld [vmem:[#allocation7 + $0x58] sm:$0xff]  ;;  %v408_v39 = vpack.c.bf16 %v77_v35, %v76_v34  ;;  %v78_v40 = vld [vmem:[#allocation5 + $0x70] sm:$0xff]  ;;  %v171_v43 = vld [vmem:[#allocation7 + $0x60] sm:$0xff] }
  0x41   :  { %418 = vmatpush3.bf16.msra.mxu1 %v417_v18  ;;  %v79_v41 = vld [vmem:[#allocation5 + $0x78] sm:$0xff]  ;;  %v429_v42 = vpack.c.bf16 %v170_v38, %v169_v37  ;;  %v172_v44 = vld [vmem:[#allocation7 + $0x68] sm:$0xff]  ;;  %v173_v48 = vld [vmem:[#allocation7 + $0x70] sm:$0xff] }
  0x42   :  { %419 = vmatprep.subr.bf16.mxu1 %v570_v0  ;;  %v411_v45 = vpack.c.bf16 %v79_v41, %v78_v40  ;;  %v432_v46 = vpack.c.bf16 %v172_v44, %v171_v43  ;;  %v63_v47 = vld [vmem:[#allocation2] sm:$0xff] }
  0x43   :  { %397 = vmatpush3.bf16.msra.mxu0 %v396_v14  ;;  %v174_v49 = vld [vmem:[#allocation7 + $0x78] sm:$0xff] }
  0x44   :  { %398 = vmatprep.subr.bf16.mxu0 %v570_v0  ;;  %v435_v50 = vpack.c.bf16 %v174_v49, %v173_v48  ;;  %v283_v51 = vld [vmem:[%s700_s2] ss:$0 sm:$0xff] }
  0x45   :  { %421 = vmatpush3.bf16.msra.mxu1 %v420_v24 }
  0x46   :  { %422 = vmatprep.subr.bf16.mxu1 %v570_v0 }
  0x47   :  { %400 = vmatpush3.bf16.msra.mxu0 %v399_v21 }
  0x48   :  { %401 = vmatprep.subr.bf16.mxu0 %v570_v0 }
  0x49   :  { %424 = vmatpush3.bf16.msra.mxu1 %v423_v30 }
  0x4a   :  { %425 = vmatprep.subr.bf16.mxu1 %v570_v0 }
  0x4b   :  { %403 = vmatpush3.bf16.msra.mxu0 %v402_v27 }
  0x4c   :  { %404 = vmatprep.subr.bf16.mxu0 %v570_v0 }
  0x4d   :  { %427 = vmatpush3.bf16.msra.mxu1 %v426_v36 }
  0x4e   :  { %428 = vmatprep.subr.bf16.mxu1 %v570_v0 }
  0x4f   :  { %406 = vmatpush3.bf16.msra.mxu0 %v405_v33 }
  0x50   :  { %407 = vmatprep.subr.bf16.mxu0 %v570_v0 }
  0x51   :  { %430 = vmatpush3.bf16.msra.mxu1 %v429_v42 }
  0x52   :  { %431 = vmatprep.subr.bf16.mxu1 %v570_v0 }
  0x53   :  { %409 = vmatpush3.bf16.msra.mxu0 %v408_v39 }
  0x54   :  { %410 = vmatprep.subr.bf16.mxu0 %v570_v0 }
  0x55   :  { %433 = vmatpush3.bf16.msra.mxu1 %v432_v46 }
  0x56   :  { %434 = vmatprep.subr.bf16.mxu1 %v570_v0 }
  0x57   :  { %412 = vmatpush3.bf16.msra.mxu0 %v411_v45 }
  0x59   :  { %436 = vmatpush3.bf16.msra.mxu1 %v435_v50 }
  0x5a   :  { %352 = vmatmul.mubr.f32.vlgmr.msra.gmra.mrb[0].mxu0 %v63_v47 }
 0x12d   :  { %v153_v52 = vpop.f32.mrb[0].mxu0 }
 0x12e   :  { %v154_v53 = vadd.f32 %v283_v51, %v153_v52  ;;  %v353_v54 = vpop.f32.mrb[1].mxu0 }
 0x130   :  { %v157_v55 = vmax.f32 %v154_v53, 0.0 }
 0x132   :  { %158 = vst [vmem:[#allocation9] sm:$0xff] %v157_v55  ;;  %387 = vmatmul.mubr.f32.vlgmr.msra.gmra.mrb[0].mxu1 %v157_v55 }
 0x133   :  { %524 = shalt.err (!%p521_p0)
}
 0x134   :  { %s525_s2 = scalar_lea.hbm %s704_s6, 128 }
 0x135   :  { %p526_p1 = scmp.ne.s32.totalorder %s704_s6, %s525_s2  ;;  %p529_p2 = scmp.lt.u32.totalorder %s525_s2, %s704_s6 }
 0x137   :  { %p531_p3 = pnand %p529_p2, %p526_p1 }
 0x139   :  { %534 = shalt.err (!%p531_p3)
}
 0x13a   :  { %272 = dma.vmem_to_hbm [thread:$0]  %s270_s11, 128, %s704_s6, [#allocation10]   ;;  %v284_v56 = vld [vmem:[%s702_s4] ss:$0 sm:$0xff] }
 0x13b   :  { %s574_s22 = smov [#allocation8]  }
 0x13c   :  { %s259_s23 = sshll.u32 %s574_s22, 4  ;;  %s260_s23 = int_to_ptr.vmem [resolvable:$true] %s259_s23 }
 0x13d   :  { %s535_s24 = scalar_lea.vmem %s260_s23, 128  ;;  %p540_p5 = scmp.lt.s32.totalorder %s260_s23, %s260_s23 }
 0x13e   :  { %p536_p4 = scmp.ne.s32.totalorder %s260_s23, %s535_s24  ;;  %p541_p6 = scmp.lt.s32.totalorder %s535_s24, %s535_s24 }
 0x140   :  { %p542_p7 = por %p541_p6, %p540_p5 }
 0x142   :  { %p543_p8 = pnand %p542_p7, %p536_p4 }
 0x205   :  { %v248_v57 = vpop.f32.mrb[0].mxu1 }
 0x206   :  { %v249_v58 = vadd.f32 %v284_v56, %v248_v57  ;;  %v388_v59 = vpop.f32.mrb[1].mxu1 }
 0x208   :  { %252 = vst [vmem:[#allocation8] sm:$0xff] %v249_v58 }
 0x209   :  { %546 = shalt.err (!%p543_p8)
}
 0x20a   :  { %s547_s26 = scalar_lea.hbm %s703_s5, 128 }
 0x20b   :  { %p548_p9 = scmp.ne.s32.totalorder %s703_s5, %s547_s26  ;;  %p551_p10 = scmp.lt.u32.totalorder %s547_s26, %s703_s5 }
 0x20d   :  { %p553_p11 = pnand %p551_p10, %p548_p9 }
 0x20f   :  { %556 = shalt.err (!%p553_p11)
}
 0x210   :  { %262 = dma.vmem_to_hbm [thread:$0]  %s260_s23, 128, %s703_s5, [#allocation4]  }
 0x211   :  { %561 = dma.done.wait [#allocation4], 128  }
 0x212   :  { %562 = vsyncadd [#allocation4], 4294967168 }
 0x213   :  { %563 = dma.done.wait [#allocation10], 128  }
 0x214   :  { %564 = vsyncadd [#allocation10], 4294967168 }
 0x215   :  { %279 = vsyncpa [#allocation3], 1 }
 0x216   :  { %280 = vsyncpa [#allocation6], 1 }
 0x217   :  { %281 = vsyncpa [#allocation4], 1 }
 0x218   :  { %282 = vsyncpa [#allocation10], 1 }

</bundles_post_ra>
